<compile_context>
chip_gen: v5e
topology: v5e:2x2
jax: 0.10.0
libtpu: 0.0.40
codegen_flags: <defaults>
</compile_context>

<pallas_src>
import functools

import jax
import jax.numpy as jnp
from jax import lax
from jax.experimental import pallas as pl
from jax.experimental.pallas import tpu as pltpu


def _confidence_loss_kernel(x_ref, lab_ref, part_ref, *,
                            num_seq, alpha, batch, block_rows, needs_mask):
    x = x_ref[...].astype(jnp.float32)          # [R, 2S]  (rows on sublanes, 2S on lanes)
    lab = lab_ref[...].astype(jnp.float32)      # [R, 1]   -> lane-broadcasts

    out = x[:, :num_seq]                        # predictions  [R, S] (static lane slice)
    conf = x[:, num_seq:]                       # confidences  [R, S]

    diff = out - lab                                         # prediction error (VPU)
    conf_label = jnp.tanh(jnp.abs(diff) * (1.0 / alpha))     # target confidence (EUP)
    cdiff = conf - conf_label                                 # confidence error

    sq = diff * diff + cdiff * cdiff            # [R, S]

    def _write(vals):
        # One partial sum per block, broadcast into a full (8,128) tile so the output
        # block writeback is a plain unmasked store; the wrapper reads [i, 0, 0].
        part_ref[...] = jnp.full(part_ref.shape, jnp.sum(vals), dtype=jnp.float32)

    if needs_mask:
        i = pl.program_id(0)
        is_last = i == pl.num_programs(0) - 1

        @pl.when(jnp.logical_not(is_last))
        def _full_block():
            _write(sq)                          # no masking cost on full blocks

        @pl.when(is_last)
        def _partial_block():
            # Zero padded rows of the final partial block (select is NaN/Inf-safe).
            valid = batch - i * block_rows
            row = lax.broadcasted_iota(jnp.int32, sq.shape, 0)
            _write(jnp.where(row < valid, sq, 0.0))
    else:
        _write(sq)


def confidence_loss(outputs, labels, *, num_seq, alpha,
                    block_rows=None, target_block_bytes=4 * 1024 * 1024):
    """outputs: [B, 2*num_seq] (f32 or bf16), labels: [B, 1]. Returns scalar f32 loss."""
    b, two_s = outputs.shape
    assert two_s == 2 * num_seq, f"expected last dim 2*num_seq={2*num_seq}, got {two_s}"
    assert labels.shape == (b, 1), f"expected labels [B,1], got {labels.shape}"

    # Pick a row-block that moves a few MiB per grid step (amortizes the ~0.35us/step
    # pipeline overhead) while keeping double-buffered blocks small enough for v7x VMEM.
    if block_rows is None:
        row_bytes = two_s * outputs.dtype.itemsize + labels.dtype.itemsize
        block_rows = max(8, target_block_bytes // row_bytes)
    block_rows = int(block_rows)
    if block_rows >= b:
        block_rows = b                                   # single full block
        needs_mask = False
    else:
        block_rows = max(8, (block_rows // 8) * 8)       # sublane-align tiled blocks
        needs_mask = (b % block_rows) != 0
    num_blocks = (b + block_rows - 1) // block_rows

    kernel = functools.partial(
        _confidence_loss_kernel,
        num_seq=int(num_seq), alpha=float(alpha),
        batch=int(b), block_rows=int(block_rows), needs_mask=bool(needs_mask))

    partials = pl.pallas_call(
        kernel,
        out_shape=jax.ShapeDtypeStruct((num_blocks, 8, 128), jnp.float32),
        grid=(num_blocks,),
        in_specs=[
            pl.BlockSpec((block_rows, two_s), lambda i: (i, 0)),   # natural layout, no transpose
            pl.BlockSpec((block_rows, 1), lambda i: (i, 0)),       # labels [B, 1]
        ],
        # Each grid step owns its own output block -> the batch axis can be "parallel"
        # (both v7x TensorCores pull HBM); no shared accumulator, no serialized reduction.
        out_specs=pl.BlockSpec((1, 8, 128), lambda i: (i, 0, 0)),
        compiler_params=pltpu.CompilerParams(
            dimension_semantics=("parallel",),
        ),
    )(outputs, labels)

    # Tiny final reduction + 1/B scale outside the kernel (num_blocks is small).
    return jnp.sum(partials[:, 0, 0]) * (1.0 / b)


def _reference_loss(outputs, labels, *, num_seq, alpha):
    """Pure-JAX reference mirroring the PyTorch loop exactly."""
    out, conf = jnp.split(outputs, 2, axis=-1)
    loss = 0.0
    for i in range(num_seq):
        o = out[:, i:i + 1]
        c = conf[:, i:i + 1]
        loss += jnp.mean((o - labels) ** 2)
        conf_label = jnp.tanh(jnp.abs(o - labels) / alpha)
        loss += jnp.mean((c - conf_label) ** 2)
    return loss


if __name__ == "__main__":
    num_seq = 8
    alpha = 0.5
    keys = jax.random.split(jax.random.PRNGKey(0), 6)

    # Test 1: small shape, single full block, no masking path.
    b1 = 8
    out1 = jax.random.normal(keys[0], (b1, 2 * num_seq), dtype=jnp.float32)
    lab1 = jax.random.normal(keys[1], (b1, 1), dtype=jnp.float32)
    loss1 = jax.block_until_ready(
        confidence_loss(out1, lab1, num_seq=num_seq, alpha=alpha))
    ref1 = jax.block_until_ready(
        _reference_loss(out1, lab1, num_seq=num_seq, alpha=alpha))
    assert jnp.allclose(loss1, ref1, rtol=1e-5, atol=1e-5), (loss1, ref1)

    # Test 2: multi-block grid, per-block parallel partial sums, partial-last-block mask
    # (batch=200, block_rows=64 -> 4 blocks, last block has 8 valid rows).
    b2 = 200
    out2 = jax.random.normal(keys[2], (b2, 2 * num_seq), dtype=jnp.float32)
    lab2 = jax.random.normal(keys[3], (b2, 1), dtype=jnp.float32)
    loss2 = jax.block_until_ready(
        confidence_loss(out2, lab2, num_seq=num_seq, alpha=alpha, block_rows=64))
    ref2 = jax.block_until_ready(
        _reference_loss(out2, lab2, num_seq=num_seq, alpha=alpha))
    assert jnp.allclose(loss2, ref2, rtol=1e-5, atol=1e-5), (loss2, ref2)

    # Test 3: model-native bf16 activations fed straight in (kernel upcasts in-register).
    b3 = 96
    out3 = jax.random.normal(keys[4], (b3, 2 * num_seq), dtype=jnp.float32).astype(jnp.bfloat16)
    lab3 = jax.random.normal(keys[5], (b3, 1), dtype=jnp.float32).astype(jnp.bfloat16)
    loss3 = jax.block_until_ready(
        confidence_loss(out3, lab3, num_seq=num_seq, alpha=alpha))
    ref3 = jax.block_until_ready(
        _reference_loss(out3.astype(jnp.float32), lab3.astype(jnp.float32),
                        num_seq=num_seq, alpha=alpha))
    assert jnp.allclose(loss3, ref3, rtol=1e-4, atol=1e-4), (loss3, ref3)

    print("KERNEL_OK")
</pallas_src>

<mosaic_0001>
module attributes {stable_mosaic.version = 11 : i64} {
  func.func @_confidence_loss_kernel(%arg0: i32, %arg1: memref<8x16xf32, #tpu.memory_space<vmem>>, %arg2: memref<8x1xf32, #tpu.memory_space<vmem>>, %arg3: memref<1x8x128xf32, #tpu.memory_space<vmem>>) attributes {dimension_semantics = [#tpu.dimension_semantics<parallel>], iteration_bounds = array<i64: 1>, scalar_prefetch = 0 : i64, scratch_operands = 0 : i64, tpu.core_type = #tpu.core_type<tc>, window_params = [{transform_indices = @transform_0, window_bounds = array<i64: 8, 16>}, {transform_indices = @transform_1, window_bounds = array<i64: 8, 1>}, {transform_indices = @transform_2, window_bounds = array<i64: 1, 8, 128>}]} {
    %c0 = arith.constant 0 : index
    %c0_0 = arith.constant 0 : index
    %0 = vector.load %arg1[%c0, %c0_0] : memref<8x16xf32, #tpu.memory_space<vmem>>, vector<8x16xf32>
    %c0_1 = arith.constant 0 : index
    %c0_2 = arith.constant 0 : index
    %1 = vector.load %arg2[%c0_1, %c0_2] : memref<8x1xf32, #tpu.memory_space<vmem>>, vector<8x1xf32>
    %2 = vector.extract_strided_slice %0 {offsets = [0, 0], sizes = [8, 8], strides = [1, 1]} : vector<8x16xf32> to vector<8x8xf32>
    %3 = vector.extract_strided_slice %0 {offsets = [0, 8], sizes = [8, 8], strides = [1, 1]} : vector<8x16xf32> to vector<8x8xf32>
    %4 = vector.broadcast %1 : vector<8x1xf32> to vector<8x8xf32>
    %5 = arith.subf %2, %4 : vector<8x8xf32>
    %6 = math.absf %5 : vector<8x8xf32>
    %cst = arith.constant 2.000000e+00 : f32
    %7 = vector.broadcast %cst : f32 to vector<8x8xf32>
    %8 = arith.mulf %6, %7 : vector<8x8xf32>
    %9 = math.tanh %8 : vector<8x8xf32>
    %10 = arith.subf %3, %9 : vector<8x8xf32>
    %11 = arith.mulf %5, %5 : vector<8x8xf32>
    %12 = arith.mulf %10, %10 : vector<8x8xf32>
    %13 = arith.addf %11, %12 : vector<8x8xf32>
    %14 = vector.shape_cast %13 : vector<8x8xf32> to vector<1x8x8xf32>
    %cst_3 = arith.constant dense<0.000000e+00> : vector<1xf32>
    %15 = vector.multi_reduction <add>, %14, %cst_3 [1, 2] : vector<1x8x8xf32> to vector<1xf32>
    %16 = vector.shape_cast %15 : vector<1xf32> to vector<1x1x1xf32>
    %17 = vector.extract %16[0, 0, 0] : f32 from vector<1x1x1xf32>
    %18 = vector.broadcast %17 : f32 to vector<1x8x128xf32>
    %c0_4 = arith.constant 0 : index
    %c0_5 = arith.constant 0 : index
    %c0_6 = arith.constant 0 : index
    %19 = vector.load %arg3[%c0_4, %c0_5, %c0_6] : memref<1x8x128xf32, #tpu.memory_space<vmem>>, vector<1x8x128xf32>
    tpu.vector_store %arg3[%c0_4, %c0_5, %c0_6], %18 {strides = array<i32>} : memref<1x8x128xf32, #tpu.memory_space<vmem>>, vector<1x8x128xf32>,
    return
  }
  func.func @transform_0(%arg0: i32) -> (i32, i32) {
    %c0_i32 = arith.constant 0 : i32
    %c0_i32_0 = arith.constant 0 : i32
    return %arg0, %c0_i32 : i32, i32
  }
  func.func @transform_1(%arg0: i32) -> (i32, i32) {
    %c0_i32 = arith.constant 0 : i32
    %c0_i32_0 = arith.constant 0 : i32
    return %arg0, %c0_i32 : i32, i32
  }
  func.func @transform_2(%arg0: i32) -> (i32, i32, i32) {
    %c0_i32 = arith.constant 0 : i32
    %c0_i32_0 = arith.constant 0 : i32
    %c0_i32_1 = arith.constant 0 : i32
    return %arg0, %c0_i32, %c0_i32_0 : i32, i32, i32
  }
}

</mosaic_0001>

<bundles_post_ra>
// kernel: tpu_custom_call.1
= control target key start
LH: loop header
LB: loop body
LE: loop exit
PB: predicated region body
PF: predicated region fallthrough
CT: control target
= control target key end

     0   :  { %s127_s0 = inlined_call_operand.vmem [shape: f32[8,16], index: 0, kind: input, shape index: {}]   ;;  %s128_s1 = inlined_call_operand.vmem [shape: f32[8,1], index: 1, kind: input, shape index: {}]   ;;  %s129_s2 = inlined_call_operand.hbm [shape: f32[1,8,128], index: 2, kind: output, shape index: {}]  }
   0x1   :  { %v13_v0 = vld [vmem:[%s128_s1] sm:$0xff] }
   0x2   :  { %7 = vsyncpa [#allocation3], 0  ;;  %v99_v1 = vmov 0   ;;  %v12_v2 = vld [vmem:[%s127_s0] sm:$0xff]  ;;  %s100_s13 = smov 8   ;;  %s101_s1 = smov 120  }
   0x3   :  { %70 = vset.pattern.permute.xlu0 %v99_v1  ;;  %vm35_vm0 = vcmask 64512   ;;  %s102_s0 = smov [#allocation2]   ;;  %s55_s17 = sshll.u32 %s129_s2, 4  ;;  %s56_s17 = int_to_ptr.hbm [resolvable:$true] %s55_s17 }
   0x4   :  { %16 = vperm.xlu0 %70, %v13_v0   ;;  %s53_s14 = sshll.u32 %s102_s0, 4  ;;  %s54_s14 = int_to_ptr.vmem [resolvable:$true] %s53_s14 }
  0x76   :  { %v17_v3 = vpop.permute.xlu0 %16 }
  0x77   :  { %v19_v4 = vsub.f32 %v12_v2, %v17_v3 }
  0x79   :  { %v20_v5 = vand.u32 2147483647, %v19_v4  ;;  %v28_v11 = vmul.f32 %v19_v4, %v19_v4 }
  0x7b   :  { %v21_v6 = vmul.f32 2.0, %v20_v5 }
  0x7d   :  { %71 = vtanh.f32 %v21_v6 }
  0x83   :  { %v72_v7 = vpop.eup %71 }
  0x84   :  { %24 = vrot.lane.b32.xlu0 %v72_v7, %s100_s13 }
  0xf6   :  { %v25_v8 = vpop.permute.xlu0 %24 }
  0xf7   :  { %v27_v9 = vsub.f32 %v12_v2, %v25_v8 }
  0xf9   :  { %v29_v10 = vmul.f32 %v27_v9, %v27_v9 }
  0xfb   :  { %31 = vrot.lane.b32.xlu1 %v29_v10, %s101_s1 }
 0x16d   :  { %v32_v12 = vpop.permute.xlu1 %31 }
 0x16e   :  { %v34_v13 = vadd.f32 %v32_v12, %v28_v11 }
 0x170   :  { %v36_v14 = vsel %vm35_vm0, %v34_v13, 0.0 }
 0x171   :  { %37 = vadd.xlane.f32.xlu1 %v36_v14 }
 0x1e4   :  { %v38_v15 = vpop.xlane.xlu1 %37 }
 0x1e5   :  { %v39_v16 = vrot.slane %v38_v15, 4 }
 0x1e7   :  { %v40_v17 = vadd.f32 %v39_v16, %v38_v15 }
 0x1e9   :  { %v41_v18 = vrot.slane %v40_v17, 2 }
 0x1eb   :  { %v42_v19 = vadd.f32 %v41_v18, %v40_v17 }
 0x1ed   :  { %v43_v20 = vrot.slane %v42_v19, 1 }
 0x1ef   :  { %v44_v21 = vadd.f32 %v43_v20, %v42_v19 }
 0x1f1   :  { %64 = vpush %v44_v21 }
 0x222   :  { %s65_s18 = spop %64 }
 0x223   :  { %v46_v22 = vstv %s65_s18 }
 0x224   :  { %47 = vst [vmem:[#allocation2] sm:$0xff] %v46_v22 }
 0x225   :  { %58 = dma.vmem_to_hbm [thread:$0]  %s54_s14, 128, %s56_s17, [#allocation3]  }
 0x226   :  { %97 = dma.done.wait [#allocation3], 128  }
 0x227   :  { %98 = vsyncadd [#allocation3], 4294967168 }
 0x228   :  { %63 = vsyncpa [#allocation3], 1 }

</bundles_post_ra>
